<compile_context>
chip_gen: v6e
topology: v6e:2x2x1
jax: 0.10.0
libtpu: 0.0.40
codegen_flags: <defaults>
</compile_context>

<pallas_src>
import numpy as np
import jax
import jax.numpy as jnp
from jax import lax
from jax.experimental import pallas as pl
from jax.experimental.pallas import tpu as pltpu


def make_rnnsent_kernel(nlayers: int, nhid: int, seq: int, batch: int, group: int):
    """Builds the Pallas kernel body for a fixed (static) LSTM configuration."""
    L, H = nlayers, nhid
    assert seq % group == 0
    n_groups = seq // group

    def kernel(xproj_ref, h0_ref, c0_ref, w_hh0_ref, *args):
        # Unpack refs (order must match the wrapper's flat_in / out_shape).
        n_rest = L - 1
        w_ih_refs = args[0:n_rest]                          # (H, 4H) bf16, layers 1..L-1
        w_hh_refs = args[n_rest:2 * n_rest]                 # (H, 4H) bf16, layers 1..L-1
        bias_refs = args[2 * n_rest:3 * n_rest]             # (1, 4H) f32,  layers 1..L-1
        fc_w_ref, fc_b_ref, dec_w_ref, dec_b_ref = args[3 * n_rest:3 * n_rest + 4]
        dec_ref, hN_ref, cN_ref = args[3 * n_rest + 4:3 * n_rest + 7]

        # Hoist all loop-invariant weight loads out of the recurrence.
        # (bf16 weights: ~6 vregs total at nlayers=2 — no spill pressure.)
        w_hh0 = w_hh0_ref[...]                              # (H, 4H) bf16
        w_ih = [w_ih_refs[l][...] for l in range(n_rest)]
        w_hh = [w_hh_refs[l][...] for l in range(n_rest)]
        bias = [bias_refs[l][...] for l in range(n_rest)]

        h_init = tuple(h0_ref[l] for l in range(L))         # each (batch, H) f32
        c_init = tuple(c0_ref[l] for l in range(L))

        def lstm_cell(gates, c_prev):
            # Two full-width transcendentals instead of four sub-width ones.
            sig = jax.nn.sigmoid(gates)                      # i, f, -, o live here
            tnh = jnp.tanh(gates)                            # g lives here
            i_g = sig[:, 0 * H:1 * H]
            f_g = sig[:, 1 * H:2 * H]
            g_g = tnh[:, 2 * H:3 * H]
            o_g = sig[:, 3 * H:4 * H]
            c_new = f_g * c_prev + i_g * g_g
            h_new = o_g * jnp.tanh(c_new)
            return h_new, c_new

        def group_step(g, carry):
            h, c = carry
            # One aligned full-tile load covering `group` timesteps.
            xgroup = xproj_ref[g]                            # (group*batch, 4H) f32
            for u in range(group):                           # unrolled x4 in Python
                x0 = xgroup[u * batch:(u + 1) * batch, :]    # static row slice

                # Layer 0: input projection (incl. merged bias) was precomputed;
                # only the recurrent matmul is on the chain (bf16 MXU, f32 acc).
                gates0 = x0 + jnp.dot(h[0].astype(jnp.bfloat16), w_hh0,
                                      preferred_element_type=jnp.float32)
                h0n, c0n = lstm_cell(gates0, c[0])
                new_h, new_c = [h0n], [c0n]
                x = h0n

                # Layers >= 1: two back-to-back bf16 dots (no concat on the
                # critical path); they pipeline in the MXU / accumulate in the
                # MRB on v7x.
                for l in range(1, L):
                    gates = (jnp.dot(x.astype(jnp.bfloat16), w_ih[l - 1],
                                     preferred_element_type=jnp.float32)
                             + jnp.dot(h[l].astype(jnp.bfloat16), w_hh[l - 1],
                                       preferred_element_type=jnp.float32)
                             + bias[l - 1])                  # (batch, 4H) f32
                    hn, cn = lstm_cell(gates, c[l])
                    new_h.append(hn)
                    new_c.append(cn)
                    x = hn
                h, c = tuple(new_h), tuple(new_c)
            return h, c

        h_fin, c_fin = lax.fori_loop(0, n_groups, group_step, (h_init, c_init))

        for l in range(L):
            hN_ref[l] = h_fin[l]
            cN_ref[l] = c_fin[l]

        # Classifier: relu(fc(output[-1])) -> decoder.  (batch, ntoken) layout;
        # the tiny transpose to decoded.t() happens in the wrapper.
        fc_out = jnp.maximum(
            jnp.dot(h_fin[L - 1], fc_w_ref[...], preferred_element_type=jnp.float32)
            + fc_b_ref[...], 0.0)                            # (batch, 10)
        dec_ref[...] = (jnp.dot(fc_out, dec_w_ref[...],
                                preferred_element_type=jnp.float32)
                        + dec_b_ref[...])                    # (batch, ntoken)

    return kernel


def rnnsent_forward(tokens, hidden, params, *, nlayers, nhid, ntoken, group=4):
    """tokens: (batch, 25) int32; hidden: (h0, c0) each (nlayers, batch, nhid)."""
    hp = lax.Precision.HIGHEST
    encoder = params["encoder"]                              # (vocab, 300)
    h0, c0 = hidden
    batch = tokens.shape[0]
    H = nhid

    # Glue: embedding lookup + the torch .view(300, B, 25) reinterpretation
    # (raw row-major reshape of the contiguous (25, B, 300) gather output).
    tok_t = jnp.transpose(tokens, (1, 0))                    # (25, batch)
    emb = jnp.take(encoder, tok_t, axis=0)                   # (25, batch, 300)
    emb = emb.reshape(300, batch, 25).astype(jnp.float32)    # (seq, batch, ninp)
    seq, _, ninp = emb.shape
    assert seq % group == 0

    # Layer-0 input projections for all timesteps in one big matmul, folding
    # in the merged layer-0 bias.  Kept in f32 and laid out as
    # (seq/group, group*batch, 4H) so each group is one aligned (8,128) tile
    # at batch=2.
    bias0 = params["b_ih"][0] + params["b_hh"][0]            # (1, 4H)
    xproj = (jnp.dot(emb.reshape(seq * batch, ninp), params["w_ih"][0],
                     precision=hp)
             + bias0).astype(jnp.float32)
    xproj = xproj.reshape(seq // group, group * batch, 4 * H)

    # bf16 MXU operands for the recurrent dots (f32 accumulation in-kernel).
    w_hh0 = params["w_hh"][0].astype(jnp.bfloat16)           # (H, 4H)
    w_ih_r = [params["w_ih"][l].astype(jnp.bfloat16) for l in range(1, nlayers)]
    w_hh_r = [params["w_hh"][l].astype(jnp.bfloat16) for l in range(1, nlayers)]
    bias_r = [(params["b_ih"][l] + params["b_hh"][l]).astype(jnp.float32)
              for l in range(1, nlayers)]

    flat_in = [xproj, h0.astype(jnp.float32), c0.astype(jnp.float32), w_hh0]
    flat_in += w_ih_r
    flat_in += w_hh_r
    flat_in += bias_r
    flat_in += [params["fc_w"], params["fc_b"], params["dec_w"], params["dec_b"]]

    out_shape = (
        jax.ShapeDtypeStruct((batch, ntoken), jnp.float32),         # decoder output
        jax.ShapeDtypeStruct((nlayers, batch, nhid), jnp.float32),  # h_n
        jax.ShapeDtypeStruct((nlayers, batch, nhid), jnp.float32),  # c_n
    )
    vmem = pl.BlockSpec(memory_space=pltpu.MemorySpace.VMEM)
    dec_bt, hN, cN = pl.pallas_call(
        make_rnnsent_kernel(nlayers, nhid, seq, batch, group),
        out_shape=out_shape,
        in_specs=[vmem] * len(flat_in),
        out_specs=(vmem, vmem, vmem),
    )(*flat_in)

    decoded = dec_bt.T                                       # (ntoken, batch) == decoded.t()
    return decoded, (hN, cN)


def reference_forward(tokens, hidden, params, *, nlayers, nhid, ntoken):
    """Pure-JAX reference matching PyTorch LSTM semantics (full f32 precision)."""
    hp = lax.Precision.HIGHEST
    encoder = params["encoder"]
    h0, c0 = hidden
    batch = tokens.shape[0]
    emb = jnp.take(encoder, tokens.T, axis=0).reshape(300, batch, 25)
    H = nhid

    def step(carry, x):
        h, c = carry
        h, c = list(h), list(c)
        for l in range(nlayers):
            gates = (jnp.dot(x, params["w_ih"][l], precision=hp) + params["b_ih"][l]
                     + jnp.dot(h[l], params["w_hh"][l], precision=hp) + params["b_hh"][l])
            i_g = jax.nn.sigmoid(gates[:, 0 * H:1 * H])
            f_g = jax.nn.sigmoid(gates[:, 1 * H:2 * H])
            g_g = jnp.tanh(gates[:, 2 * H:3 * H])
            o_g = jax.nn.sigmoid(gates[:, 3 * H:4 * H])
            c[l] = f_g * c[l] + i_g * g_g
            h[l] = o_g * jnp.tanh(c[l])
            x = h[l]
        return (tuple(h), tuple(c)), None

    (h_fin, c_fin), _ = lax.scan(step, (tuple(h0), tuple(c0)), emb)
    fc_out = jnp.maximum(jnp.dot(h_fin[-1], params["fc_w"], precision=hp) + params["fc_b"], 0.0)
    dec = jnp.dot(fc_out, params["dec_w"], precision=hp) + params["dec_b"]
    return dec.T, (jnp.stack(h_fin), jnp.stack(c_fin))


def init_params(key, *, vocab, ninp, nhid, nlayers, ntoken):
    def uniform(k, shape, bound):
        return jax.random.uniform(k, shape, jnp.float32, -bound, bound)

    keys = iter(jax.random.split(key, 8 + 4 * nlayers))
    params = {"encoder": jax.random.normal(next(keys), (vocab, 300), jnp.float32) * 0.1}
    lstm_bound = 1.0 / np.sqrt(nhid)
    w_ih, w_hh, b_ih, b_hh = [], [], [], []
    for l in range(nlayers):
        in_l = ninp if l == 0 else nhid
        # Stored pre-transposed: (in_l, 4*nhid), gate order i,f,g,o (PyTorch).
        w_ih.append(uniform(next(keys), (in_l, 4 * nhid), lstm_bound))
        w_hh.append(uniform(next(keys), (nhid, 4 * nhid), lstm_bound))
        b_ih.append(uniform(next(keys), (1, 4 * nhid), lstm_bound))
        b_hh.append(uniform(next(keys), (1, 4 * nhid), lstm_bound))
    params.update(w_ih=w_ih, w_hh=w_hh, b_ih=b_ih, b_hh=b_hh)
    fc_bound = 1.0 / np.sqrt(nhid)
    params["fc_w"] = uniform(next(keys), (nhid, 10), fc_bound)          # Linear(nhid, 10)
    params["fc_b"] = uniform(next(keys), (1, 10), fc_bound)
    dec_bound = 1.0 / np.sqrt(10)
    params["dec_w"] = uniform(next(keys), (10, ntoken), dec_bound)      # Linear(10, ntoken)
    params["dec_b"] = uniform(next(keys), (1, ntoken), dec_bound)
    return params


if __name__ == "__main__":
    # Small but forward-consistent shapes: the PyTorch forward hard-codes
    # 25 tokens/sample and emb dim 300, and its .view(300, B, 25) forces ninp == 25.
    batch, seq_tokens, emb_dim = 2, 25, 300
    vocab, ninp, nhid, nlayers, ntoken = 50, 25, 32, 2, 6

    key = jax.random.PRNGKey(0)
    k_par, k_tok = jax.random.split(key)
    params = init_params(k_par, vocab=vocab, ninp=ninp, nhid=nhid,
                         nlayers=nlayers, ntoken=ntoken)

    tokens = jax.random.randint(k_tok, (batch, seq_tokens), 0, vocab, dtype=jnp.int32)
    hidden = (jnp.zeros((nlayers, batch, nhid), jnp.float32),   # init_hidden
              jnp.zeros((nlayers, batch, nhid), jnp.float32))

    decoded, (hN, cN) = rnnsent_forward(tokens, hidden, params,
                                        nlayers=nlayers, nhid=nhid, ntoken=ntoken)
    jax.block_until_ready((decoded, hN, cN))

    # Sanity check against a pure-JAX full-precision reference.  The kernel
    # runs its recurrent matmuls with bf16 MXU inputs (f32 accumulation), so
    # tolerance is slightly looser than the pure-f32 variant.
    ref_dec, (ref_h, ref_c) = reference_forward(tokens, hidden, params,
                                                nlayers=nlayers, nhid=nhid, ntoken=ntoken)
    assert decoded.shape == (ntoken, batch)
    assert hN.shape == (nlayers, batch, nhid) and cN.shape == (nlayers, batch, nhid)
    assert np.allclose(np.asarray(decoded), np.asarray(ref_dec), rtol=3e-2, atol=3e-2)
    assert np.allclose(np.asarray(hN), np.asarray(ref_h), rtol=3e-2, atol=3e-2)
    assert np.allclose(np.asarray(cN), np.asarray(ref_c), rtol=3e-2, atol=3e-2)

    print("KERNEL_OK")
</pallas_src>

<mosaic_0001>
module attributes {stable_mosaic.version = 11 : i64} {
  func.func @kernel(%arg0: memref<75x8x128xf32, #tpu.memory_space<vmem>>, %arg1: memref<2x2x32xf32, #tpu.memory_space<vmem>>, %arg2: memref<2x2x32xf32, #tpu.memory_space<vmem>>, %arg3: memref<32x128xbf16, #tpu.memory_space<vmem>>, %arg4: memref<32x128xbf16, #tpu.memory_space<vmem>>, %arg5: memref<32x128xbf16, #tpu.memory_space<vmem>>, %arg6: memref<1x128xf32, #tpu.memory_space<vmem>>, %arg7: memref<32x10xf32, #tpu.memory_space<vmem>>, %arg8: memref<1x10xf32, #tpu.memory_space<vmem>>, %arg9: memref<10x6xf32, #tpu.memory_space<vmem>>, %arg10: memref<1x6xf32, #tpu.memory_space<vmem>>, %arg11: memref<2x6xf32, #tpu.memory_space<vmem>>, %arg12: memref<2x2x32xf32, #tpu.memory_space<vmem>>, %arg13: memref<2x2x32xf32, #tpu.memory_space<vmem>>) attributes {dimension_semantics = [], scalar_prefetch = 0 : i64, scratch_operands = 0 : i64, tpu.core_type = #tpu.core_type<tc>} {
    %c0 = arith.constant 0 : index
    %c0_0 = arith.constant 0 : index
    %0 = vector.load %arg3[%c0, %c0_0] : memref<32x128xbf16, #tpu.memory_space<vmem>>, vector<32x128xbf16>
    %c0_1 = arith.constant 0 : index
    %c0_2 = arith.constant 0 : index
    %1 = vector.load %arg4[%c0_1, %c0_2] : memref<32x128xbf16, #tpu.memory_space<vmem>>, vector<32x128xbf16>
    %c0_3 = arith.constant 0 : index
    %c0_4 = arith.constant 0 : index
    %2 = vector.load %arg5[%c0_3, %c0_4] : memref<32x128xbf16, #tpu.memory_space<vmem>>, vector<32x128xbf16>
    %c0_5 = arith.constant 0 : index
    %c0_6 = arith.constant 0 : index
    %3 = vector.load %arg6[%c0_5, %c0_6] : memref<1x128xf32, #tpu.memory_space<vmem>>, vector<1x128xf32>
    %c0_7 = arith.constant 0 : index
    %c0_8 = arith.constant 0 : index
    %c0_9 = arith.constant 0 : index
    %4 = vector.load %arg1[%c0_7, %c0_8, %c0_9] : memref<2x2x32xf32, #tpu.memory_space<vmem>>, vector<1x2x32xf32>
    %5 = vector.shape_cast %4 : vector<1x2x32xf32> to vector<2x32xf32>
    %c1 = arith.constant 1 : index
    %c0_10 = arith.constant 0 : index
    %c0_11 = arith.constant 0 : index
    %6 = vector.load %arg1[%c1, %c0_10, %c0_11] : memref<2x2x32xf32, #tpu.memory_space<vmem>>, vector<1x2x32xf32>
    %7 = vector.shape_cast %6 : vector<1x2x32xf32> to vector<2x32xf32>
    %c0_12 = arith.constant 0 : index
    %c0_13 = arith.constant 0 : index
    %c0_14 = arith.constant 0 : index
    %8 = vector.load %arg2[%c0_12, %c0_13, %c0_14] : memref<2x2x32xf32, #tpu.memory_space<vmem>>, vector<1x2x32xf32>
    %9 = vector.shape_cast %8 : vector<1x2x32xf32> to vector<2x32xf32>
    %c1_15 = arith.constant 1 : index
    %c0_16 = arith.constant 0 : index
    %c0_17 = arith.constant 0 : index
    %10 = vector.load %arg2[%c1_15, %c0_16, %c0_17] : memref<2x2x32xf32, #tpu.memory_space<vmem>>, vector<1x2x32xf32>
    %11 = vector.shape_cast %10 : vector<1x2x32xf32> to vector<2x32xf32>
    %c0_i32 = arith.constant 0 : i32
    %c75_i32 = arith.constant 75 : i32
    %12 = arith.addi %c0_i32, %c75_i32 : i32
    %c1_i32 = arith.constant 1 : i32
    %13:4 = scf.for %arg14 = %c0_i32 to %12 step %c1_i32 iter_args(%arg15 = %5, %arg16 = %7, %arg17 = %9, %arg18 = %11) -> (vector<2x32xf32>, vector<2x32xf32>, vector<2x32xf32>, vector<2x32xf32>)  : i32 {
      %39 = arith.index_cast %arg14 : i32 to index
      %c0_43 = arith.constant 0 : index
      %c0_44 = arith.constant 0 : index
      %40 = vector.load %arg0[%39, %c0_43, %c0_44] : memref<75x8x128xf32, #tpu.memory_space<vmem>>, vector<1x8x128xf32>
      %41 = vector.shape_cast %40 : vector<1x8x128xf32> to vector<8x128xf32>
      %42 = vector.extract_strided_slice %41 {offsets = [0, 0], sizes = [2, 128], strides = [1, 1]} : vector<8x128xf32> to vector<2x128xf32>
      %43 = arith.truncf %arg15 : vector<2x32xf32> to vector<2x32xbf16>
      %cst_45 = arith.constant dense<0.000000e+00> : vector<2x128xf32>
      %44 = tpu.matmul %43, %0, %cst_45 {dimension_numbers = #tpu.dot_dimension_numbers<[1], [0], [0], [1], [0, 0, 1, 1], [], []>} : vector<2x32xbf16>, vector<32x128xbf16>, vector<2x128xf32> -> vector<2x128xf32>
      %45 = arith.addf %42, %44 : vector<2x128xf32>
      %46 = arith.negf %45 : vector<2x128xf32>
      %47 = math.exp %46 : vector<2x128xf32>
      %cst_46 = arith.constant 1.000000e+00 : f32
      %48 = vector.broadcast %cst_46 : f32 to vector<2x128xf32>
      %49 = arith.addf %48, %47 : vector<2x128xf32>
      %50 = arith.divf %48, %49 : vector<2x128xf32>
      %51 = math.tanh %45 : vector<2x128xf32>
      %52 = vector.extract_strided_slice %50 {offsets = [0, 0], sizes = [2, 32], strides = [1, 1]} : vector<2x128xf32> to vector<2x32xf32>
      %53 = vector.extract_strided_slice %50 {offsets = [0, 32], sizes = [2, 32], strides = [1, 1]} : vector<2x128xf32> to vector<2x32xf32>
      %54 = vector.extract_strided_slice %51 {offsets = [0, 64], sizes = [2, 32], strides = [1, 1]} : vector<2x128xf32> to vector<2x32xf32>
      %55 = vector.extract_strided_slice %50 {offsets = [0, 96], sizes = [2, 32], strides = [1, 1]} : vector<2x128xf32> to vector<2x32xf32>
      %56 = arith.mulf %53, %arg17 : vector<2x32xf32>
      %57 = arith.mulf %52, %54 : vector<2x32xf32>
      %58 = arith.addf %56, %57 : vector<2x32xf32>
      %59 = math.tanh %58 : vector<2x32xf32>
      %60 = arith.mulf %55, %59 : vector<2x32xf32>
      %61 = arith.truncf %60 : vector<2x32xf32> to vector<2x32xbf16>
      %cst_47 = arith.constant dense<0.000000e+00> : vector<2x128xf32>
      %62 = tpu.matmul %61, %1, %cst_47 {dimension_numbers = #tpu.dot_dimension_numbers<[1], [0], [0], [1], [0, 0, 1, 1], [], []>} : vector<2x32xbf16>, vector<32x128xbf16>, vector<2x128xf32> -> vector<2x128xf32>
      %63 = arith.truncf %arg16 : vector<2x32xf32> to vector<2x32xbf16>
      %cst_48 = arith.constant dense<0.000000e+00> : vector<2x128xf32>
      %64 = tpu.matmul %63, %2, %cst_48 {dimension_numbers = #tpu.dot_dimension_numbers<[1], [0], [0], [1], [0, 0, 1, 1], [], []>} : vector<2x32xbf16>, vector<32x128xbf16>, vector<2x128xf32> -> vector<2x128xf32>
      %65 = arith.addf %62, %64 : vector<2x128xf32>
      %66 = vector.broadcast %3 : vector<1x128xf32> to vector<2x128xf32>
      %67 = arith.addf %65, %66 : vector<2x128xf32>
      %68 = arith.negf %67 : vector<2x128xf32>
      %69 = math.exp %68 : vector<2x128xf32>
      %cst_49 = arith.constant 1.000000e+00 : f32
      %70 = vector.broadcast %cst_49 : f32 to vector<2x128xf32>
      %71 = arith.addf %70, %69 : vector<2x128xf32>
      %72 = arith.divf %70, %71 : vector<2x128xf32>
      %73 = math.tanh %67 : vector<2x128xf32>
      %74 = vector.extract_strided_slice %72 {offsets = [0, 0], sizes = [2, 32], strides = [1, 1]} : vector<2x128xf32> to vector<2x32xf32>
      %75 = vector.extract_strided_slice %72 {offsets = [0, 32], sizes = [2, 32], strides = [1, 1]} : vector<2x128xf32> to vector<2x32xf32>
      %76 = vector.extract_strided_slice %73 {offsets = [0, 64], sizes = [2, 32], strides = [1, 1]} : vector<2x128xf32> to vector<2x32xf32>
      %77 = vector.extract_strided_slice %72 {offsets = [0, 96], sizes = [2, 32], strides = [1, 1]} : vector<2x128xf32> to vector<2x32xf32>
      %78 = arith.mulf %75, %arg18 : vector<2x32xf32>
      %79 = arith.mulf %74, %76 : vector<2x32xf32>
      %80 = arith.addf %78, %79 : vector<2x32xf32>
      %81 = math.tanh %80 : vector<2x32xf32>
      %82 = arith.mulf %77, %81 : vector<2x32xf32>
      %83 = vector.extract_strided_slice %41 {offsets = [2, 0], sizes = [2, 128], strides = [1, 1]} : vector<8x128xf32> to vector<2x128xf32>
      %84 = arith.truncf %60 : vector<2x32xf32> to vector<2x32xbf16>
      %cst_50 = arith.constant dense<0.000000e+00> : vector<2x128xf32>
      %85 = tpu.matmul %84, %0, %cst_50 {dimension_numbers = #tpu.dot_dimension_numbers<[1], [0], [0], [1], [0, 0, 1, 1], [], []>} : vector<2x32xbf16>, vector<32x128xbf16>, vector<2x128xf32> -> vector<2x128xf32>
      %86 = arith.addf %83, %85 : vector<2x128xf32>
      %87 = arith.negf %86 : vector<2x128xf32>
      %88 = math.exp %87 : vector<2x128xf32>
      %cst_51 = arith.constant 1.000000e+00 : f32
      %89 = vector.broadcast %cst_51 : f32 to vector<2x128xf32>
      %90 = arith.addf %89, %88 : vector<2x128xf32>
      %91 = arith.divf %89, %90 : vector<2x128xf32>
      %92 = math.tanh %86 : vector<2x128xf32>
      %93 = vector.extract_strided_slice %91 {offsets = [0, 0], sizes = [2, 32], strides = [1, 1]} : vector<2x128xf32> to vector<2x32xf32>
      %94 = vector.extract_strided_slice %91 {offsets = [0, 32], sizes = [2, 32], strides = [1, 1]} : vector<2x128xf32> to vector<2x32xf32>
      %95 = vector.extract_strided_slice %92 {offsets = [0, 64], sizes = [2, 32], strides = [1, 1]} : vector<2x128xf32> to vector<2x32xf32>
      %96 = vector.extract_strided_slice %91 {offsets = [0, 96], sizes = [2, 32], strides = [1, 1]} : vector<2x128xf32> to vector<2x32xf32>
      %97 = arith.mulf %94, %58 : vector<2x32xf32>
      %98 = arith.mulf %93, %95 : vector<2x32xf32>
      %99 = arith.addf %97, %98 : vector<2x32xf32>
      %100 = math.tanh %99 : vector<2x32xf32>
      %101 = arith.mulf %96, %100 : vector<2x32xf32>
      %102 = arith.truncf %101 : vector<2x32xf32> to vector<2x32xbf16>
      %cst_52 = arith.constant dense<0.000000e+00> : vector<2x128xf32>
      %103 = tpu.matmul %102, %1, %cst_52 {dimension_numbers = #tpu.dot_dimension_numbers<[1], [0], [0], [1], [0, 0, 1, 1], [], []>} : vector<2x32xbf16>, vector<32x128xbf16>, vector<2x128xf32> -> vector<2x128xf32>
      %104 = arith.truncf %82 : vector<2x32xf32> to vector<2x32xbf16>
      %cst_53 = arith.constant dense<0.000000e+00> : vector<2x128xf32>
      %105 = tpu.matmul %104, %2, %cst_53 {dimension_numbers = #tpu.dot_dimension_numbers<[1], [0], [0], [1], [0, 0, 1, 1], [], []>} : vector<2x32xbf16>, vector<32x128xbf16>, vector<2x128xf32> -> vector<2x128xf32>
      %106 = arith.addf %103, %105 : vector<2x128xf32>
      %107 = vector.broadcast %3 : vector<1x128xf32> to vector<2x128xf32>
      %108 = arith.addf %106, %107 : vector<2x128xf32>
      %109 = arith.negf %108 : vector<2x128xf32>
      %110 = math.exp %109 : vector<2x128xf32>
      %cst_54 = arith.constant 1.000000e+00 : f32
      %111 = vector.broadcast %cst_54 : f32 to vector<2x128xf32>
      %112 = arith.addf %111, %110 : vector<2x128xf32>
      %113 = arith.divf %111, %112 : vector<2x128xf32>
      %114 = math.tanh %108 : vector<2x128xf32>
      %115 = vector.extract_strided_slice %113 {offsets = [0, 0], sizes = [2, 32], strides = [1, 1]} : vector<2x128xf32> to vector<2x32xf32>
      %116 = vector.extract_strided_slice %113 {offsets = [0, 32], sizes = [2, 32], strides = [1, 1]} : vector<2x128xf32> to vector<2x32xf32>
      %117 = vector.extract_strided_slice %114 {offsets = [0, 64], sizes = [2, 32], strides = [1, 1]} : vector<2x128xf32> to vector<2x32xf32>
      %118 = vector.extract_strided_slice %113 {offsets = [0, 96], sizes = [2, 32], strides = [1, 1]} : vector<2x128xf32> to vector<2x32xf32>
      %119 = arith.mulf %116, %80 : vector<2x32xf32>
      %120 = arith.mulf %115, %117 : vector<2x32xf32>
      %121 = arith.addf %119, %120 : vector<2x32xf32>
      %122 = math.tanh %121 : vector<2x32xf32>
      %123 = arith.mulf %118, %122 : vector<2x32xf32>
      %124 = vector.extract_strided_slice %41 {offsets = [4, 0], sizes = [2, 128], strides = [1, 1]} : vector<8x128xf32> to vector<2x128xf32>
      %125 = arith.truncf %101 : vector<2x32xf32> to vector<2x32xbf16>
      %cst_55 = arith.constant dense<0.000000e+00> : vector<2x128xf32>
      %126 = tpu.matmul %125, %0, %cst_55 {dimension_numbers = #tpu.dot_dimension_numbers<[1], [0], [0], [1], [0, 0, 1, 1], [], []>} : vector<2x32xbf16>, vector<32x128xbf16>, vector<2x128xf32> -> vector<2x128xf32>
      %127 = arith.addf %124, %126 : vector<2x128xf32>
      %128 = arith.negf %127 : vector<2x128xf32>
      %129 = math.exp %128 : vector<2x128xf32>
      %cst_56 = arith.constant 1.000000e+00 : f32
      %130 = vector.broadcast %cst_56 : f32 to vector<2x128xf32>
      %131 = arith.addf %130, %129 : vector<2x128xf32>
      %132 = arith.divf %130, %131 : vector<2x128xf32>
      %133 = math.tanh %127 : vector<2x128xf32>
      %134 = vector.extract_strided_slice %132 {offsets = [0, 0], sizes = [2, 32], strides = [1, 1]} : vector<2x128xf32> to vector<2x32xf32>
      %135 = vector.extract_strided_slice %132 {offsets = [0, 32], sizes = [2, 32], strides = [1, 1]} : vector<2x128xf32> to vector<2x32xf32>
      %136 = vector.extract_strided_slice %133 {offsets = [0, 64], sizes = [2, 32], strides = [1, 1]} : vector<2x128xf32> to vector<2x32xf32>
      %137 = vector.extract_strided_slice %132 {offsets = [0, 96], sizes = [2, 32], strides = [1, 1]} : vector<2x128xf32> to vector<2x32xf32>
      %138 = arith.mulf %135, %99 : vector<2x32xf32>
      %139 = arith.mulf %134, %136 : vector<2x32xf32>
      %140 = arith.addf %138, %139 : vector<2x32xf32>
      %141 = math.tanh %140 : vector<2x32xf32>
      %142 = arith.mulf %137, %141 : vector<2x32xf32>
      %143 = arith.truncf %142 : vector<2x32xf32> to vector<2x32xbf16>
      %cst_57 = arith.constant dense<0.000000e+00> : vector<2x128xf32>
      %144 = tpu.matmul %143, %1, %cst_57 {dimension_numbers = #tpu.dot_dimension_numbers<[1], [0], [0], [1], [0, 0, 1, 1], [], []>} : vector<2x32xbf16>, vector<32x128xbf16>, vector<2x128xf32> -> vector<2x128xf32>
      %145 = arith.truncf %123 : vector<2x32xf32> to vector<2x32xbf16>
      %cst_58 = arith.constant dense<0.000000e+00> : vector<2x128xf32>
      %146 = tpu.matmul %145, %2, %cst_58 {dimension_numbers = #tpu.dot_dimension_numbers<[1], [0], [0], [1], [0, 0, 1, 1], [], []>} : vector<2x32xbf16>, vector<32x128xbf16>, vector<2x128xf32> -> vector<2x128xf32>
      %147 = arith.addf %144, %146 : vector<2x128xf32>
      %148 = vector.broadcast %3 : vector<1x128xf32> to vector<2x128xf32>
      %149 = arith.addf %147, %148 : vector<2x128xf32>
      %150 = arith.negf %149 : vector<2x128xf32>
      %151 = math.exp %150 : vector<2x128xf32>
      %cst_59 = arith.constant 1.000000e+00 : f32
      %152 = vector.broadcast %cst_59 : f32 to vector<2x128xf32>
      %153 = arith.addf %152, %151 : vector<2x128xf32>
      %154 = arith.divf %152, %153 : vector<2x128xf32>
      %155 = math.tanh %149 : vector<2x128xf32>
      %156 = vector.extract_strided_slice %154 {offsets = [0, 0], sizes = [2, 32], strides = [1, 1]} : vector<2x128xf32> to vector<2x32xf32>
      %157 = vector.extract_strided_slice %154 {offsets = [0, 32], sizes = [2, 32], strides = [1, 1]} : vector<2x128xf32> to vector<2x32xf32>
      %158 = vector.extract_strided_slice %155 {offsets = [0, 64], sizes = [2, 32], strides = [1, 1]} : vector<2x128xf32> to vector<2x32xf32>
      %159 = vector.extract_strided_slice %154 {offsets = [0, 96], sizes = [2, 32], strides = [1, 1]} : vector<2x128xf32> to vector<2x32xf32>
      %160 = arith.mulf %157, %121 : vector<2x32xf32>
      %161 = arith.mulf %156, %158 : vector<2x32xf32>
      %162 = arith.addf %160, %161 : vector<2x32xf32>
      %163 = math.tanh %162 : vector<2x32xf32>
      %164 = arith.mulf %159, %163 : vector<2x32xf32>
      %165 = vector.extract_strided_slice %41 {offsets = [6, 0], sizes = [2, 128], strides = [1, 1]} : vector<8x128xf32> to vector<2x128xf32>
      %166 = arith.truncf %142 : vector<2x32xf32> to vector<2x32xbf16>
      %cst_60 = arith.constant dense<0.000000e+00> : vector<2x128xf32>
      %167 = tpu.matmul %166, %0, %cst_60 {dimension_numbers = #tpu.dot_dimension_numbers<[1], [0], [0], [1], [0, 0, 1, 1], [], []>} : vector<2x32xbf16>, vector<32x128xbf16>, vector<2x128xf32> -> vector<2x128xf32>
      %168 = arith.addf %165, %167 : vector<2x128xf32>
      %169 = arith.negf %168 : vector<2x128xf32>
      %170 = math.exp %169 : vector<2x128xf32>
      %cst_61 = arith.constant 1.000000e+00 : f32
      %171 = vector.broadcast %cst_61 : f32 to vector<2x128xf32>
      %172 = arith.addf %171, %170 : vector<2x128xf32>
      %173 = arith.divf %171, %172 : vector<2x128xf32>
      %174 = math.tanh %168 : vector<2x128xf32>
      %175 = vector.extract_strided_slice %173 {offsets = [0, 0], sizes = [2, 32], strides = [1, 1]} : vector<2x128xf32> to vector<2x32xf32>
      %176 = vector.extract_strided_slice %173 {offsets = [0, 32], sizes = [2, 32], strides = [1, 1]} : vector<2x128xf32> to vector<2x32xf32>
      %177 = vector.extract_strided_slice %174 {offsets = [0, 64], sizes = [2, 32], strides = [1, 1]} : vector<2x128xf32> to vector<2x32xf32>
      %178 = vector.extract_strided_slice %173 {offsets = [0, 96], sizes = [2, 32], strides = [1, 1]} : vector<2x128xf32> to vector<2x32xf32>
      %179 = arith.mulf %176, %140 : vector<2x32xf32>
      %180 = arith.mulf %175, %177 : vector<2x32xf32>
      %181 = arith.addf %179, %180 : vector<2x32xf32>
      %182 = math.tanh %181 : vector<2x32xf32>
      %183 = arith.mulf %178, %182 : vector<2x32xf32>
      %184 = arith.truncf %183 : vector<2x32xf32> to vector<2x32xbf16>
      %cst_62 = arith.constant dense<0.000000e+00> : vector<2x128xf32>
      %185 = tpu.matmul %184, %1, %cst_62 {dimension_numbers = #tpu.dot_dimension_numbers<[1], [0], [0], [1], [0, 0, 1, 1], [], []>} : vector<2x32xbf16>, vector<32x128xbf16>, vector<2x128xf32> -> vector<2x128xf32>
      %186 = arith.truncf %164 : vector<2x32xf32> to vector<2x32xbf16>
      %cst_63 = arith.constant dense<0.000000e+00> : vector<2x128xf32>
      %187 = tpu.matmul %186, %2, %cst_63 {dimension_numbers = #tpu.dot_dimension_numbers<[1], [0], [0], [1], [0, 0, 1, 1], [], []>} : vector<2x32xbf16>, vector<32x128xbf16>, vector<2x128xf32> -> vector<2x128xf32>
      %188 = arith.addf %185, %187 : vector<2x128xf32>
      %189 = vector.broadcast %3 : vector<1x128xf32> to vector<2x128xf32>
      %190 = arith.addf %188, %189 : vector<2x128xf32>
      %191 = arith.negf %190 : vector<2x128xf32>
      %192 = math.exp %191 : vector<2x128xf32>
      %cst_64 = arith.constant 1.000000e+00 : f32
      %193 = vector.broadcast %cst_64 : f32 to vector<2x128xf32>
      %194 = arith.addf %193, %192 : vector<2x128xf32>
      %195 = arith.divf %193, %194 : vector<2x128xf32>
      %196 = math.tanh %190 : vector<2x128xf32>
      %197 = vector.extract_strided_slice %195 {offsets = [0, 0], sizes = [2, 32], strides = [1, 1]} : vector<2x128xf32> to vector<2x32xf32>
      %198 = vector.extract_strided_slice %195 {offsets = [0, 32], sizes = [2, 32], strides = [1, 1]} : vector<2x128xf32> to vector<2x32xf32>
      %199 = vector.extract_strided_slice %196 {offsets = [0, 64], sizes = [2, 32], strides = [1, 1]} : vector<2x128xf32> to vector<2x32xf32>
      %200 = vector.extract_strided_slice %195 {offsets = [0, 96], sizes = [2, 32], strides = [1, 1]} : vector<2x128xf32> to vector<2x32xf32>
      %201 = arith.mulf %198, %162 : vector<2x32xf32>
      %202 = arith.mulf %197, %199 : vector<2x32xf32>
      %203 = arith.addf %201, %202 : vector<2x32xf32>
      %204 = math.tanh %203 : vector<2x32xf32>
      %205 = arith.mulf %200, %204 : vector<2x32xf32>
      scf.yield %183, %205, %181, %203 : vector<2x32xf32>, vector<2x32xf32>, vector<2x32xf32>, vector<2x32xf32>
    }
    %c75_i32_18 = arith.constant 75 : i32
    %c0_19 = arith.constant 0 : index
    %c0_20 = arith.constant 0 : index
    %c0_21 = arith.constant 0 : index
    %14 = vector.load %arg12[%c0_19, %c0_20, %c0_21] : memref<2x2x32xf32, #tpu.memory_space<vmem>>, vector<1x2x32xf32>
    %15 = vector.shape_cast %14 : vector<1x2x32xf32> to vector<2x32xf32>
    %16 = vector.shape_cast %13#0 : vector<2x32xf32> to vector<1x2x32xf32>
    tpu.vector_store %arg12[%c0_19, %c0_20, %c0_21], %16 {strides = array<i32>} : memref<2x2x32xf32, #tpu.memory_space<vmem>>, vector<1x2x32xf32>,
    %c0_22 = arith.constant 0 : index
    %c0_23 = arith.constant 0 : index
    %c0_24 = arith.constant 0 : index
    %17 = vector.load %arg13[%c0_22, %c0_23, %c0_24] : memref<2x2x32xf32, #tpu.memory_space<vmem>>, vector<1x2x32xf32>
    %18 = vector.shape_cast %17 : vector<1x2x32xf32> to vector<2x32xf32>
    %19 = vector.shape_cast %13#2 : vector<2x32xf32> to vector<1x2x32xf32>
    tpu.vector_store %arg13[%c0_22, %c0_23, %c0_24], %19 {strides = array<i32>} : memref<2x2x32xf32, #tpu.memory_space<vmem>>, vector<1x2x32xf32>,
    %c1_25 = arith.constant 1 : index
    %c0_26 = arith.constant 0 : index
    %c0_27 = arith.constant 0 : index
    %20 = vector.load %arg12[%c1_25, %c0_26, %c0_27] : memref<2x2x32xf32, #tpu.memory_space<vmem>>, vector<1x2x32xf32>
    %21 = vector.shape_cast %20 : vector<1x2x32xf32> to vector<2x32xf32>
    %22 = vector.shape_cast %13#1 : vector<2x32xf32> to vector<1x2x32xf32>
    tpu.vector_store %arg12[%c1_25, %c0_26, %c0_27], %22 {strides = array<i32>} : memref<2x2x32xf32, #tpu.memory_space<vmem>>, vector<1x2x32xf32>,
    %c1_28 = arith.constant 1 : index
    %c0_29 = arith.constant 0 : index
    %c0_30 = arith.constant 0 : index
    %23 = vector.load %arg13[%c1_28, %c0_29, %c0_30] : memref<2x2x32xf32, #tpu.memory_space<vmem>>, vector<1x2x32xf32>
    %24 = vector.shape_cast %23 : vector<1x2x32xf32> to vector<2x32xf32>
    %25 = vector.shape_cast %13#3 : vector<2x32xf32> to vector<1x2x32xf32>
    tpu.vector_store %arg13[%c1_28, %c0_29, %c0_30], %25 {strides = array<i32>} : memref<2x2x32xf32, #tpu.memory_space<vmem>>, vector<1x2x32xf32>,
    %c0_31 = arith.constant 0 : index
    %c0_32 = arith.constant 0 : index
    %26 = vector.load %arg7[%c0_31, %c0_32] : memref<32x10xf32, #tpu.memory_space<vmem>>, vector<32x10xf32>
    %cst = arith.constant dense<0.000000e+00> : vector<2x10xf32>
    %27 = tpu.matmul %13#1, %26, %cst {dimension_numbers = #tpu.dot_dimension_numbers<[1], [0], [0], [1], [0, 0, 1, 1], [], []>} : vector<2x32xf32>, vector<32x10xf32>, vector<2x10xf32> -> vector<2x10xf32>
    %c0_33 = arith.constant 0 : index
    %c0_34 = arith.constant 0 : index
    %28 = vector.load %arg8[%c0_33, %c0_34] : memref<1x10xf32, #tpu.memory_space<vmem>>, vector<1x10xf32>
    %29 = vector.broadcast %28 : vector<1x10xf32> to vector<2x10xf32>
    %30 = arith.addf %27, %29 : vector<2x10xf32>
    %cst_35 = arith.constant 0.000000e+00 : f32
    %31 = vector.broadcast %cst_35 : f32 to vector<2x10xf32>
    %32 = arith.maximumf %30, %31 : vector<2x10xf32>
    %c0_36 = arith.constant 0 : index
    %c0_37 = arith.constant 0 : index
    %33 = vector.load %arg9[%c0_36, %c0_37] : memref<10x6xf32, #tpu.memory_space<vmem>>, vector<10x6xf32>
    %cst_38 = arith.constant dense<0.000000e+00> : vector<2x6xf32>
    %34 = tpu.matmul %32, %33, %cst_38 {dimension_numbers = #tpu.dot_dimension_numbers<[1], [0], [0], [1], [0, 0, 1, 1], [], []>} : vector<2x10xf32>, vector<10x6xf32>, vector<2x6xf32> -> vector<2x6xf32>
    %c0_39 = arith.constant 0 : index
    %c0_40 = arith.constant 0 : index
    %35 = vector.load %arg10[%c0_39, %c0_40] : memref<1x6xf32, #tpu.memory_space<vmem>>, vector<1x6xf32>
    %36 = vector.broadcast %35 : vector<1x6xf32> to vector<2x6xf32>
    %37 = arith.addf %34, %36 : vector<2x6xf32>
    %c0_41 = arith.constant 0 : index
    %c0_42 = arith.constant 0 : index
    %38 = vector.load %arg11[%c0_41, %c0_42] : memref<2x6xf32, #tpu.memory_space<vmem>>, vector<2x6xf32>
    tpu.vector_store %arg11[%c0_41, %c0_42], %37 {strides = array<i32>} : memref<2x6xf32, #tpu.memory_space<vmem>>, vector<2x6xf32>,
    return
  }
}

</mosaic_0001>

<bundles_post_ra>
// kernel: tpu_custom_call.1
= control target key start
LH: loop header
LB: loop body
LE: loop exit
PB: predicated region body
PF: predicated region fallthrough
CT: control target
= control target key end

     0   :  { %19 = vsyncpa [#allocation3], 0  ;;  %s2010_s0 = inlined_call_operand.hbm [shape: f32[75,8,128], index: 0, kind: input, shape index: {}]   ;;  %s2011_s1 = inlined_call_operand.vmem [shape: f32[2,2,32], index: 1, kind: input, shape index: {}]   ;;  %s2012_s2 = inlined_call_operand.vmem [shape: f32[2,2,32], index: 2, kind: input, shape index: {}]   ;;  %s2013_s3 = inlined_call_operand.vmem [shape: bf16[32,128], index: 3, kind: input, shape index: {}]   ;;  %s2014_s4 = inlined_call_operand.vmem [shape: bf16[32,128], index: 4, kind: input, shape index: {}]   ;;  %s2015_s5 = inlined_call_operand.vmem [shape: bf16[32,128], index: 5, kind: input, shape index: {}]   ;;  %s2016_s6 = inlined_call_operand.vmem [shape: f32[1,128], index: 6, kind: input, shape index: {}]   ;;  %s2017_s7 = inlined_call_operand.vmem [shape: f32[32,10], index: 7, kind: input, shape index: {}]   ;;  %s2018_s8 = inlined_call_operand.vmem [shape: f32[1,10], index: 8, kind: input, shape index: {}]   ;;  %s2019_s9 = inlined_call_operand.vmem [shape: f32[10,6], index: 9, kind: input, shape index: {}]   ;;  %s2020_s10 = inlined_call_operand.vmem [shape: f32[1,6], index: 10, kind: input, shape index: {}]   ;;  %s2021_s11 = inlined_call_operand.hbm [shape: f32[2,6], index: 11, kind: output, shape index: {0}]   ;;  %s2022_s12 = inlined_call_operand.hbm [shape: f32[2,2,32], index: 12, kind: output, shape index: {1}]   ;;  %s2023_s13 = inlined_call_operand.hbm [shape: f32[2,2,32], index: 13, kind: output, shape index: {2}]  }
   0x1   :  { %20 = vsyncpa [#allocation4], 0 }
   0x2   :  { %21 = vsyncpa [#allocation7], 0  ;;  %s1602_s25 = smov [#allocation2]  }
   0x3   :  { %s27_s26 = sshll.u32 %s1602_s25, 4  ;;  %s28_s26 = int_to_ptr.vmem [resolvable:$true] %s27_s26 }
   0x4   :  { %s1484_s27 = scalar_lea.vmem %s28_s26, 9600  ;;  %p1489_p1 = scmp.lt.s32.totalorder %s28_s26, %s28_s26 }
   0x5   :  { %p1485_p0 = scmp.ne.s32.totalorder %s28_s26, %s1484_s27  ;;  %p1490_p2 = scmp.lt.s32.totalorder %s1484_s27, %s1484_s27 }
   0x7   :  { %p1491_p3 = por %p1490_p2, %p1489_p1 }
   0x9   :  { %p1492_p4 = pnand %p1491_p3, %p1485_p0 }
   0xb   :  { %1495 = shalt.err (!%p1492_p4)
}
   0xc   :  { %s1603_s28 = smov 128   ;;  %s1604_s29 = smov 8  }
   0xd   :  { %33 = dma.hbm_to_vmem [thread:$0]  %s2010_s0, 9600, %s28_s26, [#allocation3], %s1603_s28, %s1603_s28, %s1604_s29  }
   0xe   :  { %1576 = dma.done.wait [#allocation3], 9600  }
   0xf   :  { %1577 = vsyncadd [#allocation3], 4294957696  ;;  %v1693_v0 = vld [vmem:[%s2013_s3] sm:$0xf]  ;;  %v1698_v1 = vld [vmem:[%s2013_s3 + $0x4] sm:$0xf] }
  0x10   :  { %v1703_v2 = vld [vmem:[%s2013_s3 + $0x8] sm:$0xf]  ;;  %v1708_v3 = vld [vmem:[%s2013_s3 + $0xc] sm:$0xf]  ;;  %v1713_v4 = vld [vmem:[%s2014_s4] sm:$0xf] }
  0x11   :  { %v1718_v5 = vld [vmem:[%s2014_s4 + $0x4] sm:$0xf]  ;;  %v1723_v6 = vld [vmem:[%s2014_s4 + $0x8] sm:$0xf]  ;;  %v1728_v7 = vld [vmem:[%s2014_s4 + $0xc] sm:$0xf] }
  0x12   :  { %v1733_v8 = vld [vmem:[%s2015_s5] sm:$0xf]  ;;  %v1738_v9 = vld [vmem:[%s2015_s5 + $0x4] sm:$0xf]  ;;  %v1743_v10 = vld [vmem:[%s2015_s5 + $0x8] sm:$0xf] }
  0x13   :  { %v1748_v11 = vld [vmem:[%s2015_s5 + $0xc] sm:$0xf]  ;;  %v1753_v12 = vld [vmem:[%s2016_s6] ss:$0 sm:$0xff]  ;;  %v1164_v14 = vld [vmem:[%s2011_s1 + $0x2] sm:$0x3]  }
  0x14   :  { %v71_v13 = vld [vmem:[%s2011_s1] sm:$0x3]   ;;  %v1165_v16 = vld [vmem:[%s2012_s2 + $0x2] sm:$0x3]   ;;  %s1775_s6 = smov 0  }
  0x15   :  { %v74_v15 = vld [vmem:[%s2012_s2] sm:$0x3]  }
  0x16 LB: > { %v1790_v17 = vcombine.low %v1703_v2, %v1708_v3  ;;  %v1605_v18 = vmov 0.0   ;;  %vm1606_vm0 = vmmov 0   ;;  %v1798_v19 = vcombine.low %v1693_v0, %v1698_v1  ;;  %s1166_s1 = sshll.u32 %s1600_s6, 3  ;;  %s1607_s27 = smov 64   ;;  %s1600_s6 = sphi %s1775_s6, %s82_s6   ;;  %v1596_v13 = vphi %v71_v13, %v2027_v13   ;;  %v1592_v14 = vphi %v1164_v14, %v2026_v14   ;;  %v1588_v15 = vphi %v74_v15, %v2025_v15   ;;  %v1584_v16 = vphi %v1165_v16, %v2024_v16  }
  0x17   : > { %1243 = vmatprep.subr.bf16.mxu0 %v1605_v18  ;;  %1247 = vmatprep.mubr.msk.bf16.mxu0 %vm1606_vm0, %v1605_v18  ;;  %v90_v20 = vpack.c.bf16 %v1596_v13, %v1596_v13  ;;  %vm103_vm1 = vcmask 261120   ;;  %s88_s2 = scalar_lea.vmem [#allocation2], %s1166_s1  ;;  %s1608_s28 = smov 32   ;;  %v1821_v38 = vcombine.low %v1743_v10, %v1748_v11  ;;  %v1825_v39 = vcombine.low %v1723_v6, %v1728_v7 }
  0x18   : > { %1244 = vmatpush3.bf16.msra.mxu0 %v1790_v17  ;;  %1251 = vmatprep.subr.bf16.mxu1 %v1605_v18  ;;  %v1810_v21 = vld [vmem:[%s88_s2] sm:$0xff]  ;;  %v1830_v40 = vcombine.low %v1733_v8, %v1738_v9  ;;  %v1835_v41 = vcombine.low %v1713_v4, %v1718_v5  ;;  %v177_v42 = vpack.c.bf16 %v1592_v14, %v1592_v14  ;;  %s1609_s29 = smov 96   ;;  %s82_s6 = sadd.s32 1, %s1600_s6  }
  0x19   : > { %1245 = vmatprep.subr.bf16.mxu0 %v1605_v18  ;;  %1255 = vmatprep.mubr.msk.bf16.mxu1 %vm1606_vm0, %v1605_v18  ;;  %p79_p5 = scmp.ge.s32.totalorder %s82_s6, 75  }
  0x1a   : > { %1252 = vmatpush3.bf16.msra.mxu1 %v1821_v38  ;;  %vm1611_vm2 = vmmov (%p79_p5), 0   ;;  %v924_v0 = vld [vmem:[%s2017_s7] sm:$0xff] (%p79_p5)  ;;  %v1011_v1 = vld [vmem:[%s2019_s9 + $0x8] sm:$0x3] (%p79_p5)  ;;  %vm1023_vm3 = vcmask (%p79_p5), 1041408   ;;  %vm1019_vm4 = vcmask (%p79_p5), 80896  }
  0x1b   : > { %1253 = vmatprep.subr.bf16.mxu1 %v1605_v18  ;;  %v1010_v2 = vld [vmem:[%s2019_s9] sm:$0xff] (%p79_p5)  ;;  %vm917_vm5 = vcmask (%p79_p5), 254976  }
  0x1c   : > { %1246 = vmatpush3.bf16.msra.mxu0 %v1798_v19  ;;  %v1194_v3 = vld [vmem:[%s2018_s8] ss:$0 sm:$0xff] (%p79_p5) }
  0x1d   : > { %1259 = vmatprep.subr.bf16.mxu0 %v1605_v18 }
  0x1e   : > { %1254 = vmatpush3.bf16.msra.mxu1 %v1830_v40 }
  0x1f   : > { %1248 = vmatmul.mubr.msk.bf16.vlgmr.msra.gmra.mxu0 %vm103_vm1, %v90_v20  ;;  %1267 = vmatprep.subr.bf16.mxu1 %v1605_v18 }
  0x20   : > { %1263 = vmatprep.mubr.msk.bf16.mxu0 %vm1606_vm0, %v1605_v18  ;;  %1260 = vmatpush3.bf16.msra.mxu0 %v1825_v39 }
  0x21   : > { %1261 = vmatprep.subr.bf16.mxu0 %v1605_v18  ;;  %1256 = vmatmul.mubr.msk.bf16.vlgmr.msra.gmra.mxu1 %vm103_vm1, %v177_v42 }
  0x22   : > { %1268 = vmatpush3.bf16.msra.mxu1 %v1790_v17  ;;  %1271 = vmatprep.mubr.msk.bf16.mxu1 %vm1606_vm0, %v1605_v18 }
  0x23   : > { %1269 = vmatprep.subr.bf16.mxu1 %v1605_v18 }
  0x24   : > { %1262 = vmatpush3.bf16.msra.mxu0 %v1835_v41 }
  0x25   : > { %1275 = vmatprep.subr.bf16.mxu0 %v1605_v18 }
  0x26   : > { %1270 = vmatpush3.bf16.msra.mxu1 %v1798_v19 }
  0x27   : > { %1283 = vmatprep.subr.bf16.mxu1 %v1605_v18 }
  0xdf   : > { %v141_v22 = vpop.f32.mrf.mxu0 }
  0xe0   : > { %v147_v23 = vadd.f32 %v141_v22, %v1810_v21 }
  0xe1   : > { %v1249_v24 = vpop.f32.mrf.mxu0  ;;  %v227_v47 = vpop.f32.mrf.mxu1 }
  0xe2   : > { %1412 = vtanh.f32 %v147_v23  ;;  %v1170_v28 = vmul.f32 -1.442695, %v147_v23 }
  0xe3   : > { %v144_v25 = vpop.f32.mrf.mxu0  ;;  %v1257_v48 = vpop.f32.mrf.mxu1 }
  0xe4   : > { %1414 = vpow2.f32 %v1170_v28 }
  0xe5   : > { %v1250_v26 = vpop.f32.mrf.mxu0  ;;  %v230_v49 = vpop.f32.mrf.mxu1 }
  0xe7   : > { %v1258_v50 = vpop.f32.mrf.mxu1 }
  0xef   : > { %v1413_v27 = vpop.eup %1412 }
  0xf0   : > { %161 = vrot.lane.b32.xlu0 %v1413_v27, %s1607_s27 }
  0xf1   : > { %v1415_v29 = vpop.eup %1414 }
  0xf2   : > { %v151_v30 = vadd.f32 1.0, %v1415_v29 }
  0xf4   : > { %156 = vrot.lane.b32.xlu0 %v1588_v15, %s1608_s28  ;;  %1416 = vrcp.f32 %v151_v30 }
 0x101   : > { %v1417_v31 = vpop.eup %1416 }
 0x162   : > { %v162_v32 = vpop.permute.xlu0 %161 }
 0x163   : > { %v164_v33 = vmul.f32 %v1417_v31, %v162_v32 }
 0x165   : > { %166 = vrot.lane.b32.xlu1 %v164_v33, %s1608_s28 }
 0x166   : > { %v157_v34 = vpop.permute.xlu0 %156 }
 0x167   : > { %v159_v35 = vmul.f32 %v1417_v31, %v157_v34 }
 0x1d7   : > { %v167_v36 = vpop.permute.xlu1 %166 }
 0x1d8   : > { %v1816_v37 = vadd.f32 %v167_v36, %v159_v35 }
 0x1da   : > { %1418 = vtanh.f32 %v1816_v37  ;;  %v378_v32 = vrot.slane %v1816_v37, 6 }
 0x1e7   : > { %v1419_v43 = vpop.eup %1418 }
 0x1e8   : > { %172 = vrot.lane.b32.xlu1 %v1419_v43, %s1607_s27 }
 0x25a   : > { %v173_v44 = vpop.permute.xlu1 %172 }
 0x25b   : > { %v175_v45 = vmul.f32 %v1417_v31, %v173_v44 }
 0x25d   : > { %v176_v46 = vpack.c.bf16 %v175_v45, %v175_v45 }
 0x25f   : > { %234 = vrot.lane.b32.xlu0 %v176_v46, %s1608_s28 }
 0x2d1   : > { %v235_v51 = vpop.permute.xlu0 %234 }
 0x2d2   : > { %1264 = vmatmul.mubr.msk.bf16.vlgmr.msra.gmra.mxu0 %vm103_vm1, %v235_v51  ;;  %1272 = vmatmul.mubr.msk.bf16.vlgmr.msra.gmra.mxu1 %vm103_vm1, %v235_v51 }
 0x2d3   : > { %1276 = vmatpush3.bf16.msra.mxu0 %v1821_v38  ;;  %1284 = vmatpush3.bf16.msra.mxu1 %v1825_v39 }
 0x2d4   : > { %1277 = vmatprep.subr.bf16.mxu0 %v1605_v18  ;;  %1285 = vmatprep.subr.bf16.mxu1 %v1605_v18 }
 0x2d5   : > { %1279 = vmatprep.mubr.msk.bf16.mxu0 %vm1606_vm0, %v1605_v18  ;;  %1287 = vmatprep.mubr.msk.bf16.mxu1 %vm1606_vm0, %v1605_v18 }
 0x2d7   : > { %1278 = vmatpush3.bf16.msra.mxu0 %v1830_v40  ;;  %1286 = vmatpush3.bf16.msra.mxu1 %v1835_v41 }
 0x2d8   : > { %1291 = vmatprep.subr.bf16.mxu0 %v1605_v18  ;;  %1299 = vmatprep.subr.bf16.mxu1 %v1605_v18 }
 0x392   : > { %v285_v52 = vpop.f32.mrf.mxu0  ;;  %v360_v53 = vpop.f32.mrf.mxu1 }
 0x393   : > { %v286_v54 = vadd.f32 %v285_v52, %v227_v47  ;;  %v367_v55 = vrot.slane %v360_v53, 6 }
 0x394   : > { %v1265_v56 = vpop.f32.mrf.mxu0  ;;  %v1273_v57 = vpop.f32.mrf.mxu1 }
 0x395   : > { %v297_v58 = vadd.f32 %v1753_v12, %v286_v54  ;;  %v369_v59 = vadd.f32 %v367_v55, %v1810_v21 }
 0x396   : > { %v288_v60 = vpop.f32.mrf.mxu0  ;;  %v363_v61 = vpop.f32.mrf.mxu1 }
 0x397   : > { %1420 = vtanh.f32 %v297_v58  ;;  %v1178_v15 = vmul.f32 -1.442695, %v297_v58  ;;  %v1180_v20 = vmul.f32 -1.442695, %v369_v59 }
 0x398   : > { %1422 = vtanh.f32 %v369_v59  ;;  %v1266_v62 = vpop.f32.mrf.mxu0  ;;  %v1274_v63 = vpop.f32.mrf.mxu1 }
 0x399   : > { %1424 = vpow2.f32 %v1178_v15 }
 0x39a   : > { %1426 = vpow2.f32 %v1180_v20 }
 0x3a4   : > { %v1421_v13 = vpop.eup %1420 }
 0x3a5   : > { %v1423_v14 = vpop.eup %1422  ;;  %311 = vrot.lane.b32.xlu1 %v1421_v13, %s1607_s27 }
 0x3a6   : > { %382 = vrot.lane.b32.xlu0 %v1423_v14, %s1607_s27  ;;  %v1425_v22 = vpop.eup %1424 }
 0x3a7   : > { %v1427_v23 = vpop.eup %1426  ;;  %v301_v24 = vadd.f32 1.0, %v1425_v22 }
 0x3a8   : > { %v373_v25 = vadd.f32 1.0, %v1427_v23 }
 0x3a9   : > { %306 = vrot.lane.b32.xlu1 %v1584_v16, %s1608_s28  ;;  %1428 = vrcp.f32 %v301_v24 }
 0x3aa   : > { %1430 = vrcp.f32 %v373_v25 }
 0x3b6   : > { %v1429_v26 = vpop.eup %1428 }
 0x3b7   : > { %v1431_v28 = vpop.eup %1430 }
 0x3b8   : > { %v380_v35 = vmul.f32 %v1431_v28, %v378_v32 }
 0x417   : > { %v312_v27 = vpop.permute.xlu1 %311 }
 0x418   : > { %v383_v29 = vpop.permute.xlu0 %382  ;;  %v314_v30 = vmul.f32 %v1429_v26, %v312_v27 }
 0x419   : > { %v385_v31 = vmul.f32 %v1431_v28, %v383_v29 }
 0x41a   : > { %316 = vrot.lane.b32.xlu0 %v314_v30, %s1608_s28 }
 0x41b   : > { %387 = vrot.lane.b32.xlu1 %v385_v31, %s1608_s28  ;;  %v307_v16 = vpop.permute.xlu1 %306 }
 0x41c   : > { %v309_v33 = vmul.f32 %v1429_v26, %v307_v16 }
 0x48c   : > { %v317_v34 = vpop.permute.xlu0 %316 }
 0x48d   : > { %v1877_v36 = vadd.f32 %v317_v34, %v309_v33  ;;  %v388_v42 = vpop.permute.xlu1 %387 }
 0x48e   : > { %v1879_v43 = vadd.f32 %v388_v42, %v380_v35 }
 0x48f   : > { %1432 = vtanh.f32 %v1877_v36 }
 0x490   : > { %1434 = vtanh.f32 %v1879_v43 }
 0x49c   : > { %v1433_v44 = vpop.eup %1432 }
 0x49d   : > { %v1435_v45 = vpop.eup %1434  ;;  %322 = vrot.lane.b32.xlu0 %v1433_v44, %s1607_s27 }
 0x49e   : > { %393 = vrot.lane.b32.xlu1 %v1435_v45, %s1607_s27 }
 0x50f   : > { %v323_v46 = vpop.permute.xlu0 %322 }
 0x510   : > { %v325_v37 = vmul.f32 %v1429_v26, %v323_v46  ;;  %v394_v47 = vpop.permute.xlu1 %393 }
 0x511   : > { %v396_v48 = vmul.f32 %v1431_v28, %v394_v47 }
 0x512   : > { %v398_v49 = vpack.c.bf16 %v325_v37, %v325_v37  ;;  %v569_v37 = vrot.slane %v1879_v43, 6 }
 0x513   : > { %v397_v50 = vpack.c.bf16 %v396_v48, %v396_v48 }
 0x514   : > { %400 = vrot.lane.b32.xlu0 %v398_v49, %s1608_s28 }
 0x515   : > { %v446_v51 = vrot.slane %v397_v50, 1 }
 0x517   : > { %447 = vrot.lane.b32.xlu1 %v446_v51, %s1608_s28 }
 0x586   : > { %v401_v52 = vpop.permute.xlu0 %400 }
 0x587   : > { %1280 = vmatmul.mubr.msk.bf16.vlgmr.msra.gmra.mxu0 %vm103_vm1, %v401_v52 }
 0x588   : > { %1292 = vmatpush3.bf16.msra.mxu0 %v1790_v17  ;;  %1295 = vmatprep.mubr.msk.bf16.mxu0 %vm1606_vm0, %v1605_v18 }
 0x589   : > { %v448_v53 = vpop.permute.xlu1 %447  ;;  %1293 = vmatprep.subr.bf16.mxu0 %v1605_v18 }
 0x58a   : > { %1288 = vmatmul.mubr.msk.bf16.vlgmr.msra.gmra.mxu1 %vm103_vm1, %v448_v53 }
 0x58b   : > { %1300 = vmatpush3.bf16.msra.mxu1 %v1821_v38  ;;  %1303 = vmatprep.mubr.msk.bf16.mxu1 %vm1606_vm0, %v1605_v18 }
 0x58c   : > { %1294 = vmatpush3.bf16.msra.mxu0 %v1798_v19  ;;  %1301 = vmatprep.subr.bf16.mxu1 %v1605_v18 }
 0x58d   : > { %1307 = vmatprep.subr.bf16.mxu0 %v1605_v18 }
 0x58f   : > { %1296 = vmatmul.mubr.msk.bf16.vlgmr.msra.gmra.mxu0 %vm103_vm1, %v448_v53  ;;  %1302 = vmatpush3.bf16.msra.mxu1 %v1830_v40 }
 0x590   : > { %1315 = vmatprep.subr.bf16.mxu1 %v1605_v18  ;;  %1308 = vmatpush3.bf16.msra.mxu0 %v1825_v39 }
 0x591   : > { %1309 = vmatprep.subr.bf16.mxu0 %v1605_v18  ;;  %1311 = vmatprep.mubr.msk.bf16.mxu0 %vm1606_vm0, %v1605_v18 }
 0x594   : > { %1310 = vmatpush3.bf16.msra.mxu0 %v1835_v41 }
 0x595   : > { %1323 = vmatprep.subr.bf16.mxu0 %v1605_v18 }
 0x647   : > { %v439_v54 = vpop.f32.mrf.mxu0 }
 0x649   : > { %v1281_v55 = vpop.f32.mrf.mxu0 }
 0x64a   : > { %v486_v56 = vpop.f32.mrf.mxu1 }
 0x64b   : > { %v487_v57 = vadd.f32 %v486_v56, %v439_v54  ;;  %v442_v58 = vpop.f32.mrf.mxu0 }
 0x64c   : > { %v1289_v59 = vpop.f32.mrf.mxu1 }
 0x64d   : > { %v492_v60 = vadd.f32 %v1753_v12, %v487_v57  ;;  %v1282_v61 = vpop.f32.mrf.mxu0 }
 0x64e   : > { %v489_v62 = vpop.f32.mrf.mxu1 }
 0x64f   : > { %1436 = vtanh.f32 %v492_v60  ;;  %v551_v63 = vpop.f32.mrf.mxu0  ;;  %v1183_v26 = vmul.f32 -1.442695, %v492_v60 }
 0x650   : > { %v1290_v13 = vpop.f32.mrf.mxu1  ;;  %v558_v14 = vrot.slane %v551_v63, 4 }
 0x651   : > { %v1297_v15 = vpop.f32.mrf.mxu0 }
 0x652   : > { %v560_v20 = vadd.f32 %v558_v14, %v1810_v21 }
 0x653   : > { %v554_v22 = vpop.f32.mrf.mxu0 }
 0x654   : > { %1438 = vtanh.f32 %v560_v20  ;;  %v1185_v27 = vmul.f32 -1.442695, %v560_v20 }
 0x655   : > { %v1298_v23 = vpop.f32.mrf.mxu0  ;;  %1440 = vpow2.f32 %v1183_v26 }
 0x656   : > { %1442 = vpow2.f32 %v1185_v27 }
 0x65c   : > { %v1437_v24 = vpop.eup %1436 }
 0x65d   : > { %502 = vrot.lane.b32.xlu0 %v1437_v24, %s1607_s27 }
 0x661   : > { %v1439_v25 = vpop.eup %1438 }
 0x662   : > { %573 = vrot.lane.b32.xlu1 %v1439_v25, %s1607_s27  ;;  %v1441_v28 = vpop.eup %1440 }
 0x663   : > { %v496_v29 = vadd.f32 1.0, %v1441_v28  ;;  %v1443_v30 = vpop.eup %1442 }
 0x664   : > { %v564_v31 = vadd.f32 1.0, %v1443_v30 }
 0x665   : > { %1444 = vrcp.f32 %v496_v29 }
 0x666   : > { %1446 = vrcp.f32 %v564_v31 }
 0x672   : > { %v1445_v16 = vpop.eup %1444 }
 0x673   : > { %v1447_v34 = vpop.eup %1446  ;;  %v500_v44 = vmul.f32 %v1445_v16, %v1877_v36 }
 0x674   : > { %v571_v47 = vmul.f32 %v1447_v34, %v569_v37 }
 0x6cf   : > { %v503_v32 = vpop.permute.xlu0 %502 }
 0x6d0   : > { %v505_v33 = vmul.f32 %v1445_v16, %v503_v32 }
 0x6d2   : > { %507 = vrot.lane.b32.xlu0 %v505_v33, %s1608_s28 }
 0x6d4   : > { %v574_v35 = vpop.permute.xlu1 %573 }
 0x6d5   : > { %v576_v42 = vmul.f32 %v1447_v34, %v574_v35 }
 0x6d7   : > { %578 = vrot.lane.b32.xlu1 %v576_v42, %s1608_s28 }
 0x744   : > { %v508_v45 = vpop.permute.xlu0 %507 }
 0x745   : > { %v1915_v46 = vadd.f32 %v508_v45, %v500_v44 }
 0x747   : > { %1448 = vtanh.f32 %v1915_v46 }
 0x749   : > { %v579_v48 = vpop.permute.xlu1 %578 }
 0x74a   : > { %v1919_v49 = vadd.f32 %v579_v48, %v571_v47 }
 0x74c   : > { %1450 = vtanh.f32 %v1919_v49 }
 0x754   : > { %v1449_v50 = vpop.eup %1448 }
 0x755   : > { %513 = vrot.lane.b32.xlu0 %v1449_v50, %s1607_s27 }
 0x759   : > { %v1451_v51 = vpop.eup %1450 }
 0x75a   : > { %584 = vrot.lane.b32.xlu1 %v1451_v51, %s1607_s27 }
 0x7c7   : > { %v514_v36 = vpop.permute.xlu0 %513 }
 0x7c8   : > { %v516_v52 = vmul.f32 %v1445_v16, %v514_v36 }
 0x7ca   : > { %v589_v53 = vpack.c.bf16 %v516_v52, %v516_v52 }
 0x7cc   : > { %591 = vrot.lane.b32.xlu0 %v589_v53, %s1608_s28  ;;  %v585_v43 = vpop.permute.xlu1 %584 }
 0x7cd   : > { %v587_v54 = vmul.f32 %v1447_v34, %v585_v43  ;;  %v760_v34 = vrot.slane %v1919_v49, 6 }
 0x7cf   : > { %v588_v55 = vpack.c.bf16 %v587_v54, %v587_v54 }
 0x7d1   : > { %v637_v56 = vrot.slane %v588_v55, 2 }
 0x7d3   : > { %638 = vrot.lane.b32.xlu1 %v637_v56, %s1608_s28 }
 0x83e   : > { %v592_v57 = vpop.permute.xlu0 %591 }
 0x83f   : > { %1304 = vmatmul.mubr.msk.bf16.vlgmr.msra.gmra.mxu1 %vm103_vm1, %v592_v57 }
 0x840   : > { %1316 = vmatpush3.bf16.msra.mxu1 %v1790_v17  ;;  %1319 = vmatprep.mubr.msk.bf16.mxu1 %vm1606_vm0, %v1605_v18 }
 0x841   : > { %1317 = vmatprep.subr.bf16.mxu1 %v1605_v18 }
 0x844   : > { %1318 = vmatpush3.bf16.msra.mxu1 %v1798_v19 }
 0x845   : > { %v639_v58 = vpop.permute.xlu1 %638  ;;  %1331 = vmatprep.subr.bf16.mxu1 %v1605_v18 }
 0x846   : > { %1312 = vmatmul.mubr.msk.bf16.vlgmr.msra.gmra.mxu0 %vm103_vm1, %v639_v58 }
 0x847   : > { %1320 = vmatmul.mubr.msk.bf16.vlgmr.msra.gmra.mxu1 %vm103_vm1, %v639_v58  ;;  %1324 = vmatpush3.bf16.msra.mxu0 %v1821_v38 }
 0x848   : > { %1332 = vmatpush3.bf16.msra.mxu1 %v1825_v39  ;;  %1325 = vmatprep.subr.bf16.mxu0 %v1605_v18 }
 0x849   : > { %1333 = vmatprep.subr.bf16.mxu1 %v1605_v18  ;;  %1327 = vmatprep.mubr.msk.bf16.mxu0 %vm1606_vm0, %v1605_v18 }
 0x84a   : > { %1335 = vmatprep.mubr.msk.bf16.mxu1 %vm1606_vm0, %v1605_v18 }
 0x84b   : > { %1326 = vmatpush3.bf16.msra.mxu0 %v1830_v40 }
 0x84c   : > { %1334 = vmatpush3.bf16.msra.mxu1 %v1835_v41 }
 0x8ff   : > { %v630_v17 = vpop.f32.mrf.mxu1 }
 0x901   : > { %v1305_v19 = vpop.f32.mrf.mxu1 }
 0x903   : > { %v633_v59 = vpop.f32.mrf.mxu1 }
 0x905   : > { %v1306_v38 = vpop.f32.mrf.mxu1 }
 0x906   : > { %v677_v60 = vpop.f32.mrf.mxu0 }
 0x907   : > { %v678_v39 = vadd.f32 %v677_v60, %v630_v17  ;;  %v742_v61 = vpop.f32.mrf.mxu1 }
 0x908   : > { %v749_v62 = vrot.slane %v742_v61, 2  ;;  %v1313_v63 = vpop.f32.mrf.mxu0 }
 0x909   : > { %v683_v13 = vadd.f32 %v1753_v12, %v678_v39  ;;  %v1321_v14 = vpop.f32.mrf.mxu1 }
 0x90a   : > { %v751_v15 = vadd.f32 %v749_v62, %v1810_v21  ;;  %v680_v20 = vpop.f32.mrf.mxu0 }
 0x90b   : > { %1452 = vtanh.f32 %v683_v13  ;;  %v745_v18 = vpop.f32.mrf.mxu1  ;;  %v1188_v24 = vmul.f32 -1.442695, %v683_v13 }
 0x90c   : > { %1454 = vtanh.f32 %v751_v15  ;;  %v1314_v40 = vpop.f32.mrf.mxu0  ;;  %v1190_v25 = vmul.f32 -1.442695, %v751_v15 }
 0x90d   : > { %v1322_v41 = vpop.f32.mrf.mxu1  ;;  %1456 = vpow2.f32 %v1188_v24 }
 0x90e   : > { %1458 = vpow2.f32 %v1190_v25 }
 0x918   : > { %v1453_v22 = vpop.eup %1452 }
 0x919   : > { %v1455_v23 = vpop.eup %1454  ;;  %693 = vrot.lane.b32.xlu1 %v1453_v22, %s1607_s27 }
 0x91a   : > { %764 = vrot.lane.b32.xlu0 %v1455_v23, %s1607_s27  ;;  %v1457_v26 = vpop.eup %1456 }
 0x91b   : > { %v1459_v27 = vpop.eup %1458  ;;  %v687_v28 = vadd.f32 1.0, %v1457_v26 }
 0x91c   : > { %v755_v21 = vadd.f32 1.0, %v1459_v27 }
 0x91d   : > { %1460 = vrcp.f32 %v687_v28 }
 0x91e   : > { %1462 = vrcp.f32 %v755_v21 }
 0x92a   : > { %v1461_v29 = vpop.eup %1460 }
 0x92b   : > { %v1463_v31 = vpop.eup %1462  ;;  %v691_v35 = vmul.f32 %v1461_v29, %v1915_v46 }
 0x92c   : > { %v762_v44 = vmul.f32 %v1463_v31, %v760_v34  ;;  %v925_v34 = vld [vmem:[%s2017_s7 + $0x8] sm:$0xff] (%p79_p5) }
 0x98b   : > { %v694_v30 = vpop.permute.xlu1 %693 }
 0x98c   : > { %v696_v16 = vmul.f32 %v1461_v29, %v694_v30  ;;  %v765_v32 = vpop.permute.xlu0 %764 }
 0x98d   : > { %v767_v33 = vmul.f32 %v1463_v31, %v765_v32  ;;  %v1610_v32 = vmov (%p79_p5), 0.0  }
 0x98e   : > { %698 = vrot.lane.b32.xlu1 %v696_v16, %s1608_s28  ;;  %1339 = vmatprep.subr.mxu0 (%p79_p5), %v1610_v32 }
 0x98f   : > { %769 = vrot.lane.b32.xlu0 %v767_v33, %s1608_s28  ;;  %v926_v33 = vld [vmem:[%s2017_s7 + $0x10] sm:$0xff] (%p79_p5)  ;;  %1350 = vmatprep.subr.mxu1 (%p79_p5), %v1610_v32 }
 0xa00   : > { %v699_v42 = vpop.permute.xlu1 %698 }
 0xa01   : > { %v701_v45 = vadd.f32 %v699_v42, %v691_v35  ;;  %v770_v37 = vpop.permute.xlu0 %769 }
 0xa02   : > { %v772_v47 = vadd.f32 %v770_v37, %v762_v44 }
 0xa03   : > { %1464 = vtanh.f32 %v701_v45 }
 0xa04   : > { %1466 = vtanh.f32 %v772_v47  ;;  %v909_v41 = vrot.slane %v772_v47, 6 }
 0xa10   : > { %v1465_v48 = vpop.eup %1464 }
 0xa11   : > { %v1467_v50 = vpop.eup %1466  ;;  %704 = vrot.lane.b32.xlu1 %v1465_v48, %s1607_s27 }
 0xa12   : > { %775 = vrot.lane.b32.xlu0 %v1467_v50, %s1607_s27 }
 0xa83   : > { %v705_v51 = vpop.permute.xlu1 %704 }
 0xa84   : > { %v707_v36 = vmul.f32 %v1461_v29, %v705_v51  ;;  %v776_v52 = vpop.permute.xlu0 %775 }
 0xa85   : > { %v778_v53 = vmul.f32 %v1463_v31, %v776_v52  ;;  %v927_v31 = vld [vmem:[%s2017_s7 + $0x18] sm:$0xff] (%p79_p5)  ;;  %s1612_s7 = smov (%p79_p5), [#allocation6]  }
 0xa86   : > { %v780_v49 = vpack.c.bf16 %v707_v36, %v707_v36  ;;  %s1114_s24 = sshll.u32 (%p79_p5), %s1612_s7, 4  ;;  %s1115_s24 = int_to_ptr.vmem [resolvable:$true] %s1114_s24 }
 0xa87   : > { %v779_v43 = vpack.c.bf16 %v778_v53, %v778_v53  ;;  %v900_v40 = vrot.slane %v778_v53, 6  ;;  %s1496_s9 = scalar_lea.vmem (%p79_p5), %s1115_s24, 64  ;;  %p1501_p7 = scmp.lt.s32.totalorder (%p79_p5), %s1115_s24, %s1115_s24 }
 0xa88   : > { %782 = vrot.lane.b32.xlu0 %v780_v49, %s1608_s28  ;;  %p1497_p6 = scmp.ne.s32.totalorder (%p79_p5), %s1115_s24, %s1496_s9  ;;  %p1502_p8 = scmp.lt.s32.totalorder (%p79_p5), %s1496_s9, %s1496_s9 }
 0xa89   : > { %v828_v46 = vrot.slane %v779_v43, 3 }
 0xa8a   :  { %p1503_p9 = por (%p79_p5), %p1502_p8, %p1501_p7 }
 0xa8b   : > { %829 = vrot.lane.b32.xlu1 %v828_v46, %s1608_s28 }
 0xa8c   :  { %p1504_p10 = pnand (%p79_p5), %p1503_p9, %p1497_p6 }
 0xafa   : > { %v783_v54 = vpop.permute.xlu0 %782 }
 0xafb   : > { %1328 = vmatmul.mubr.msk.bf16.vlgmr.msra.gmra.mxu0 %vm103_vm1, %v783_v54 }
 0xafc   :  { %1347 = vmatprep.mubr.msk.f32.mxu0 (%p79_p5), %vm1611_vm2, %v1610_v32  ;;  %1340 = vmatpush3.msra.mxu0 (%p79_p5), %v927_v31 }
 0xafd   : > { %v830_v55 = vpop.permute.xlu1 %829  ;;  %1341 = vmatprep.subr.mxu0 (%p79_p5), %v1610_v32 }
 0xafe   : > { %1336 = vmatmul.mubr.msk.bf16.vlgmr.msra.gmra.mxu1 %vm103_vm1, %v830_v55  ;;  %1342 = vmatpush3.msra.mxu0 (%p79_p5), %v926_v33 }
 0xaff   :  { %1354 = vmatprep.mubr.msk.f32.mxu1 (%p79_p5), %vm1611_vm2, %v1610_v32  ;;  %1343 = vmatprep.subr.mxu0 (%p79_p5), %v1610_v32 }
 0xb00   :  { %1344 = vmatpush3.msra.mxu0 (%p79_p5), %v925_v34  ;;  %1351 = vmatpush3.msk.msra.mxu1 (%p79_p5), %vm1023_vm3, %v1011_v1 }
 0xb01   :  { %1345 = vmatprep.subr.mxu0 (%p79_p5), %v1610_v32  ;;  %1352 = vmatprep.subr.mxu1 (%p79_p5), %v1610_v32 }
 0xb02   :  { %1346 = vmatpush3.msra.mxu0 (%p79_p5), %v924_v0  ;;  %1353 = vmatpush3.msra.mxu1 (%p79_p5), %v1010_v2 }
 0xbbb   : > { %v821_v56 = vpop.f32.mrf.mxu0 }
 0xbbd   : > { %v1329_v57 = vpop.f32.mrf.mxu0 }
 0xbbe   : > { %v868_v58 = vpop.f32.mrf.mxu1 }
 0xbbf   : > { %v869_v17 = vadd.f32 %v868_v58, %v821_v56  ;;  %v824_v19 = vpop.f32.mrf.mxu0 }
 0xbc0   : > { %v1337_v59 = vpop.f32.mrf.mxu1 }
 0xbc1   : > { %v874_v38 = vadd.f32 %v1753_v12, %v869_v17  ;;  %v1330_v60 = vpop.f32.mrf.mxu0 }
 0xbc2   : > { %v871_v39 = vpop.f32.mrf.mxu1 }
 0xbc3   : > { %1468 = vtanh.f32 %v874_v38  ;;  %v1193_v63 = vmul.f32 -1.442695, %v874_v38 }
 0xbc4   : > { %v1338_v61 = vpop.f32.mrf.mxu1 }
 0xbc5   : > { %1470 = vpow2.f32 %v1193_v63 }
 0xbd0   : > { %v1469_v62 = vpop.eup %1468 }
 0xbd1   : > { %884 = vrot.lane.b32.xlu0 %v1469_v62, %s1607_s27 }
 0xbd2   : > { %v1471_v13 = vpop.eup %1470 }
 0xbd3   : > { %v878_v14 = vadd.f32 1.0, %v1471_v13 }
 0xbd5   : > { %1472 = vrcp.f32 %v878_v14 }
 0xbe2   : > { %v1473_v15 = vpop.eup %1472 }
 0xbe3   : > { %v882_v22 = vmul.f32 %v1473_v15, %v701_v45 }
 0xc43   : > { %v885_v20 = vpop.permute.xlu0 %884 }
 0xc44   : > { %v887_v18 = vmul.f32 %v1473_v15, %v885_v20 }
 0xc46   : > { %889 = vrot.lane.b32.xlu1 %v887_v18, %s1608_s28 }
 0xc4a   : > { %901 = vrot.lane.b32.xlu1 %v900_v40, %s1608_s28 }
 0xc4e   : > { %910 = vrot.lane.b32.xlu1 %v909_v41, %s1609_s29 }
 0xcb8   : > { %v890_v23 = vpop.permute.xlu1 %889 }
 0xcb9   : > { %v892_v24 = vadd.f32 %v890_v23, %v882_v22 }
 0xcbb   : > { %1474 = vtanh.f32 %v892_v24 }
 0xcbc   : > { %v902_v25 = vpop.permute.xlu1 %901  }
 0xcbd   : > { %v2027_v13 = vmov %v902_v25  ;;  %918 = vst.msk [vmem:[#allocation6] sm:$0x3] (%p79_p5), %vm917_vm5, %v902_v25 }
 0xcc0   : > { %v911_v26 = vpop.permute.xlu1 %910  }
 0xcc1   :  { %919 = vst.msk [vmem:[#allocation8] sm:$0x3] (%p79_p5), %vm917_vm5, %v911_v26 }
 0xcc8   : > { %v1475_v27 = vpop.eup %1474 }
 0xcc9   : > { %895 = vrot.lane.b32.xlu0 %v1475_v27, %s1607_s27 }
 0xd3b   : > { %v896_v28 = vpop.permute.xlu0 %895 }
 0xd3c   : > { %v898_v21 = vmul.f32 %v1473_v15, %v896_v28  ;;  %v2025_v15 = vmov %v911_v26 }
 0xd3e   : > { %905 = vrot.lane.b32.xlu0 %v898_v21, %s1608_s28 }
 0xd42   : > { %914 = vrot.lane.b32.xlu0 %v892_v24, %s1609_s29 }
 0xdb0   : > { %v906_v29 = vpop.permute.xlu0 %905  }
 0xdb1   : > { %v2026_v14 = vmov %v906_v29  ;;  %81 = sbr.rel (!%p79_p5) target bundleno = 22 (0x16), region = 96  ;;  %1348 = vmatmul.mubr.msk.f32.vlgmr.msra.gmra.mxu0 (%p79_p5), %vm103_vm1, %v906_v29  ;;  %921 = vst.msk [vmem:[#allocation6 + $0x2] sm:$0x3] (%p79_p5), %vm917_vm5, %v906_v29 }
 0xdb4   : > { %v915_v30 = vpop.permute.xlu0 %914  }
 0xdb5   : > { %v2024_v16 = vmov %v915_v30  ;;  %923 = vst.msk [vmem:[#allocation8 + $0x2] sm:$0x3] (%p79_p5), %vm917_vm5, %v915_v30 }
 0xe71   :  { %v1005_v4 = vpop.f32.mrf.mxu0 }
 0xe72   :  { %v1006_v5 = vadd.f32 %v1194_v3, %v1005_v4 }
 0xe73   :  { %v1349_v6 = vpop.f32.mrf.mxu0 }
 0xe74   :  { %v1009_v7 = vmax.f32 %v1006_v5, 0.0 }
 0xe76   :  { %1355 = vmatmul.mubr.msk.f32.vlgmr.msra.gmra.mxu1 %vm1019_vm4, %v1009_v7 }
 0xe77   :  { %1507 = shalt.err (!%p1504_p10)
}
 0xe78   :  { %s1613_s8 = smov 32   ;;  %s1614_s25 = smov 2  }
 0xe79   :  { %1120 = dma.vmem_to_hbm [thread:$0]  %s1115_s24, 64, %s2022_s12, [#allocation7], %s1613_s8, %s1613_s8, %s1614_s25  }
 0xe7a   :  { %s1615_s6 = smov [#allocation8]  }
 0xe7b   :  { %s1126_s1 = sshll.u32 %s1615_s6, 4  ;;  %s1127_s1 = int_to_ptr.vmem [resolvable:$true] %s1126_s1 }
 0xe7c   :  { %s1516_s2 = scalar_lea.vmem %s1127_s1, 64  ;;  %p1521_p12 = scmp.lt.s32.totalorder %s1127_s1, %s1127_s1 }
 0xe7d   :  { %p1517_p11 = scmp.ne.s32.totalorder %s1127_s1, %s1516_s2  ;;  %p1522_p13 = scmp.lt.s32.totalorder %s1516_s2, %s1516_s2 }
 0xe7f   :  { %p1523_p0 = por %p1522_p13, %p1521_p12 }
 0xe81   :  { %p1524_p1 = pnand %p1523_p0, %p1517_p11 }
 0xe83   :  { %1527 = shalt.err (!%p1524_p1)
}
 0xe84   :  { %1132 = dma.vmem_to_hbm [thread:$0]  %s1127_s1, 64, %s2023_s13, [#allocation7], %s1613_s8, %s1613_s8, %s1614_s25   ;;  %vm1097_vm6 = vcmask 41984  }
 0xe85   :  { %v1196_v8 = vld [vmem:[%s2020_s10] ss:$0 sm:$0xff]  ;;  %s1616_s30 = smov [#allocation5]  }
 0xe86   :  { %s1105_s12 = sshll.u32 %s1616_s30, 4  ;;  %s1106_s12 = int_to_ptr.vmem [resolvable:$true] %s1105_s12 }
 0xe87   :  { %s1536_s14 = scalar_lea.vmem %s1106_s12, 32  ;;  %p1541_p3 = scmp.lt.s32.totalorder %s1106_s12, %s1106_s12 }
 0xe88   :  { %p1537_p2 = scmp.ne.s32.totalorder %s1106_s12, %s1536_s14  ;;  %p1542_p4 = scmp.lt.s32.totalorder %s1536_s14, %s1536_s14 }
 0xe8a   :  { %p1543_p5 = por %p1542_p4, %p1541_p3 }
 0xe8c   :  { %p1544_p6 = pnand %p1543_p5, %p1537_p2 }
 0xf36   :  { %v1093_v9 = vpop.f32.mrf.mxu1 }
 0xf37   :  { %v1094_v10 = vadd.f32 %v1196_v8, %v1093_v9 }
 0xf38   :  { %v1356_v11 = vpop.f32.mrf.mxu1 }
 0xf39   :  { %1098 = vst.msk [vmem:[#allocation5] sm:$0x3] %vm1097_vm6, %v1094_v10 }
 0xf3a   :  { %1547 = shalt.err (!%p1544_p6)
}
 0xf3b   :  { %1108 = dma.vmem_to_hbm [thread:$0]  %s1106_s12, 32, %s2021_s11, [#allocation4]  }
 0xf3c   :  { %1578 = dma.done.wait [#allocation4], 32  }
 0xf3d   :  { %1579 = vsyncadd [#allocation4], 4294967264 }
 0xf3e   :  { %1580 = dma.done.wait [#allocation7], 128  }
 0xf3f   :  { %1581 = vsyncadd [#allocation7], 4294967168 }
 0xf40   :  { %1142 = vsyncpa [#allocation3], 1 }
 0xf41   :  { %1143 = vsyncpa [#allocation4], 1 }
 0xf42   :  { %1144 = vsyncpa [#allocation7], 1 }

</bundles_post_ra>
